<compile_context>
chip_gen: v7x
topology: tpu7x:2x2x1
jax: 0.10.0
libtpu: 0.0.40
codegen_flags: <defaults>
</compile_context>

<pallas_src>
import numpy as np
import jax
import jax.numpy as jnp
from jax.experimental import pallas as pl
from jax.experimental.pallas import tpu as pltpu


def _masked_mean_kernel(tile_ids_ref, x_ref, m_ref, o_ref):
    # tile_ids_ref: (n_active,) int32 in SMEM (used only by the index_maps)
    # x_ref: (tbc, thw)   one (b, c) pair per row, spatial positions along lanes
    # m_ref: (1, thw)     f32 selection mask, pre-scaled by 1/K (duplicates counted)
    # o_ref: (tbc, 1)     f32 accumulator-output, resident across the tile axis
    del tile_ids_ref
    j = pl.program_id(1)

    @pl.when(j == 0)
    def _init():
        o_ref[...] = jnp.zeros_like(o_ref)

    x = x_ref[...].astype(jnp.float32)          # (tbc, thw)
    m = m_ref[...]                              # (1, thw)
    # Zero unselected / out-of-bounds lanes before the contraction so garbage in
    # ragged edge tiles (or non-finite unselected values) cannot reach the sum.
    x = jnp.where(m != 0.0, x, 0.0)
    # MXU contraction over the spatial tile: (tbc, thw) . (1, thw)^T -> (tbc, 1).
    o_ref[...] += jax.lax.dot_general(
        x, m, (((1,), (1,)), ((), ())), preferred_element_type=jnp.float32)


def classifier2_forward(x, indice, fc_weight):
    """x: (B, C, H, W); indice: (K,) flat spatial indices (static, as in the
    PyTorch module); fc_weight: (num_classes, C) == nn.Linear.weight (no bias)."""
    B, C, H, W = x.shape
    HW = H * W
    BC = B * C
    K = int(indice.shape[0])
    NC = fc_weight.shape[0]

    if K == 0:  # torch.mean over an empty dim yields NaN
        return jnp.full((B, NC), jnp.nan, dtype=jnp.float32)

    itemsize = int(jnp.dtype(x.dtype).itemsize)

    # ---- generation-aware VMEM budget --------------------------------------
    try:
        vmem_cap = int(getattr(pltpu.get_tpu_info(), "vmem_capacity_bytes",
                               64 * 1024 * 1024))
    except Exception:
        vmem_cap = 64 * 1024 * 1024            # conservative (v7x) default
    x_buf_budget = vmem_cap // 6               # per x buffer (double-buffered)
    vmem_limit = (vmem_cap * 3) // 4

    # ---- spatial (lane) tile ------------------------------------------------
    # 512 lanes keeps per-row DMA segments >= 2 KiB f32 (near HBM roofline)
    # while giving useful tile-skip granularity for the gather.
    hw_ceil = -(-HW // 128) * 128
    thw = HW if hw_ceil <= 512 else 512        # full-dim tile is always legal

    # `indice` is fixed at module construction; treat it as static so we can
    # skip HW tiles that contain no selected position.
    try:
        ind_np = np.asarray(indice).astype(np.int64).ravel()
    except Exception:
        ind_np = None                          # traced under jit -> full scan

    def _tiles(t):
        n_total = -(-HW // t)
        if ind_np is None:
            return n_total, np.arange(n_total, dtype=np.int32)
        return n_total, np.unique(ind_np // t).astype(np.int32)

    n_total, active = _tiles(thw)
    # Dense selection on a large map: bigger tiles cut grid-step overhead and
    # lose no traffic.
    if hw_ceil > 2048 and 2 * len(active) > n_total:
        thw = 2048
        n_total, active = _tiles(thw)
    n_active = int(len(active))

    # ---- row (sublane) tile -------------------------------------------------
    # Trim rows, never the lane width, to satisfy the VMEM budget.
    max_rows = max(8, x_buf_budget // (2 * thw * itemsize))
    tbc = min(BC, 512, (max_rows // 8) * 8)
    if BC >= 16:                               # keep >= 2 row blocks (v7x megacore)
        half = -(-BC // 2)
        tbc = min(tbc, -(-half // 8) * 8)
    # tbc is either a multiple of 8 or equal to BC -> legal block shape.
    n_rows = -(-BC // tbc)

    # ---- operands -----------------------------------------------------------
    x2d = x.reshape(BC, HW)                    # free reshape: no copy, no cast
    mask_len = n_total * thw                   # mask covers the padded tile range
    # Duplicate indices are counted (matches index_select + mean); pre-scale by
    # 1/K so the in-kernel masked sum is already the mean.
    mask = jnp.zeros((mask_len,), jnp.float32).at[indice].add(1.0)
    mask = (mask / np.float32(K)).reshape(1, mask_len)
    tile_ids = jnp.asarray(active, dtype=jnp.int32)

    sums = pl.pallas_call(
        _masked_mean_kernel,
        out_shape=jax.ShapeDtypeStruct((BC, 1), jnp.float32),
        grid_spec=pltpu.PrefetchScalarGridSpec(
            num_scalar_prefetch=1,
            grid=(n_rows, n_active),
            in_specs=[
                pl.BlockSpec((tbc, thw), lambda i, j, tids: (i, tids[j])),
                pl.BlockSpec((1, thw), lambda i, j, tids: (0, tids[j])),
            ],
            out_specs=pl.BlockSpec((tbc, 1), lambda i, j, tids: (i, 0)),
        ),
        compiler_params=pltpu.CompilerParams(
            dimension_semantics=("parallel", "arbitrary"),
            vmem_limit_bytes=int(vmem_limit),
        ),
    )(tile_ids, x2d, mask)

    # Tiny epilogue projection: (B, C) @ (C, NC).  Negligible next to streaming
    # x, so a plain dot is cheaper than another kernel launch.
    means = sums.reshape(B, C)
    return jnp.dot(means, fc_weight.astype(jnp.float32).T,
                   preferred_element_type=jnp.float32)


def classifier2_reference(x, indice, fc_weight):
    B, C, H, W = x.shape
    x1 = x.reshape(B, C, H * W).transpose(0, 2, 1)   # (B, HW, C)
    x2 = x1[:, indice, :]                            # (B, K, C)
    x3 = jnp.mean(x2, axis=1)                        # (B, C)
    return x3 @ fc_weight.T                          # (B, NC)


if __name__ == "__main__":
    # Small shapes consistent with the module: in_features == channels.
    B, C, H, W = 2, 4, 16, 16
    num_classes = 3

    key = jax.random.PRNGKey(0)
    kx, kw = jax.random.split(key)

    x = jax.random.normal(kx, (B, C, H, W), dtype=jnp.float32)
    # Flat spatial indices within H*W = 256; includes a duplicate to exercise
    # index_select + mean semantics (duplicates counted).
    indice = jnp.array([3, 17, 42, 42, 100, 129, 200, 255], dtype=jnp.int32)
    # nn.Linear(in_features=C, out_features=num_classes, bias=False) weight.
    fc_weight = jax.random.normal(kw, (num_classes, C), dtype=jnp.float32) * 0.1

    out = classifier2_forward(x, indice, fc_weight)
    jax.block_until_ready(out)
    assert out.shape == (B, num_classes)

    # Strict f32 parity (no wrapper-side dtype conversion any more).
    ref = classifier2_reference(x, indice, fc_weight)
    assert jnp.allclose(out, ref, atol=1e-5, rtol=1e-5), (out, ref)

    print("KERNEL_OK")
</pallas_src>

<mosaic_0001>
module attributes {stable_mosaic.version = 11 : i64} {
  func.func @_masked_mean_kernel(%arg0: i32, %arg1: i32, %arg2: memref<1xi32, #tpu.memory_space<smem>>, %arg3: memref<8x256xf32, #tpu.memory_space<vmem>>, %arg4: memref<1x256xf32, #tpu.memory_space<vmem>>, %arg5: memref<8x1xf32, #tpu.memory_space<vmem>>) attributes {dimension_semantics = [#tpu.dimension_semantics<parallel>, #tpu.dimension_semantics<arbitrary>], iteration_bounds = array<i64: 1, 1>, scalar_prefetch = 1 : i64, scratch_operands = 0 : i64, tpu.core_type = #tpu.core_type<tc>, window_params = [{transform_indices = @transform_0, window_bounds = array<i64: 8, 256>}, {transform_indices = @transform_1, window_bounds = array<i64: 1, 256>}, {transform_indices = @transform_2, window_bounds = array<i64: 8, 1>}]} {
    %c0_i32 = arith.constant 0 : i32
    %0 = arith.cmpi eq, %arg1, %c0_i32 : i32
    %1 = arith.extui %0 : i1 to i32
    %c0_i32_0 = arith.constant 0 : i32
    %2 = arith.cmpi ne, %1, %c0_i32_0 : i32
    scf.if %2 {
      %cst_10 = arith.constant 0.000000e+00 : f32
      %15 = vector.broadcast %cst_10 : f32 to vector<8x1xf32>
      %c0_11 = arith.constant 0 : index
      %c0_12 = arith.constant 0 : index
      %16 = vector.load %arg5[%c0_11, %c0_12] : memref<8x1xf32, #tpu.memory_space<vmem>>, vector<8x1xf32>
      tpu.vector_store %arg5[%c0_11, %c0_12], %15 {strides = array<i32>} : memref<8x1xf32, #tpu.memory_space<vmem>>, vector<8x1xf32>,
    } else {
    }
    %c0 = arith.constant 0 : index
    %c0_1 = arith.constant 0 : index
    %3 = vector.load %arg3[%c0, %c0_1] : memref<8x256xf32, #tpu.memory_space<vmem>>, vector<8x256xf32>
    %c0_2 = arith.constant 0 : index
    %c0_3 = arith.constant 0 : index
    %4 = vector.load %arg4[%c0_2, %c0_3] : memref<1x256xf32, #tpu.memory_space<vmem>>, vector<1x256xf32>
    %cst = arith.constant 0.000000e+00 : f32
    %5 = vector.broadcast %cst : f32 to vector<1x256xf32>
    %6 = arith.cmpf one, %4, %5 : vector<1x256xf32>
    %cst_4 = arith.constant 0.000000e+00 : f32
    %7 = vector.shape_cast %6 : vector<1x256xi1> to vector<1x256xi1>
    %8 = vector.broadcast %7 : vector<1x256xi1> to vector<8x256xi1>
    %9 = vector.broadcast %cst_4 : f32 to vector<8x256xf32>
    %10 = arith.select %8, %3, %9 : vector<8x256xi1>, vector<8x256xf32>
    %c0_5 = arith.constant 0 : index
    %c0_6 = arith.constant 0 : index
    %11 = vector.load %arg5[%c0_5, %c0_6] : memref<8x1xf32, #tpu.memory_space<vmem>>, vector<8x1xf32>
    %cst_7 = arith.constant dense<0.000000e+00> : vector<8x1xf32>
    %12 = tpu.matmul %10, %4, %cst_7 {dimension_numbers = #tpu.dot_dimension_numbers<[1], [1], [0], [0], [0, 0, 1, 0], [], []>} : vector<8x256xf32>, vector<1x256xf32>, vector<8x1xf32> -> vector<8x1xf32>
    %13 = arith.addf %11, %12 : vector<8x1xf32>
    %c0_8 = arith.constant 0 : index
    %c0_9 = arith.constant 0 : index
    %14 = vector.load %arg5[%c0_8, %c0_9] : memref<8x1xf32, #tpu.memory_space<vmem>>, vector<8x1xf32>
    tpu.vector_store %arg5[%c0_8, %c0_9], %13 {strides = array<i32>} : memref<8x1xf32, #tpu.memory_space<vmem>>, vector<8x1xf32>,
    return
  }
  func.func @transform_0(%arg0: i32, %arg1: i32, %arg2: memref<1xi32, #tpu.memory_space<smem>>) -> (i32, i32) {
    %0 = arith.index_cast %arg1 : i32 to index
    %1 = memref.load %arg2[%0] : memref<1xi32, #tpu.memory_space<smem>>
    %c0_i32 = arith.constant 0 : i32
    return %arg0, %1 : i32, i32
  }
  func.func @transform_1(%arg0: i32, %arg1: i32, %arg2: memref<1xi32, #tpu.memory_space<smem>>) -> (i32, i32) {
    %0 = arith.index_cast %arg1 : i32 to index
    %1 = memref.load %arg2[%0] : memref<1xi32, #tpu.memory_space<smem>>
    %c0_i32 = arith.constant 0 : i32
    %c0_i32_0 = arith.constant 0 : i32
    return %c0_i32, %1 : i32, i32
  }
  func.func @transform_2(%arg0: i32, %arg1: i32, %arg2: memref<1xi32, #tpu.memory_space<smem>>) -> (i32, i32) {
    %c0_i32 = arith.constant 0 : i32
    %c0_i32_0 = arith.constant 0 : i32
    return %arg0, %c0_i32 : i32, i32
  }
}

</mosaic_0001>

<bundles_post_ra>
// kernel: tpu_custom_call.1
= control target key start
LH: loop header
LB: loop body
LE: loop exit
PB: predicated region body
PF: predicated region fallthrough
CT: control target
= control target key end

     0   :  { %9 = vsyncpa [#allocation5], 0  ;;  %s136_s18 = smov [#allocation4]   ;;  %s188_s0 = inlined_call_operand.<no memory space> [shape: s32[1], index: 0, kind: input, shape index: {}]   ;;  %s189_s1 = inlined_call_operand.hbm [shape: f32[8,256], index: 1, kind: input, shape index: {}]   ;;  %s190_s2 = inlined_call_operand.vmem [shape: f32[1,256], index: 2, kind: input, shape index: {}]   ;;  %s191_s3 = inlined_call_operand.vmem [shape: f32[8,1], index: 3, kind: output, shape index: {}]  }
   0x1   :  { %s106_s14 = sshll.u32 %s188_s0, 8  ;;  %s20_s19 = sshll.u32 %s136_s18, 4  ;;  %s21_s19 = int_to_ptr.vmem [resolvable:$true] %s20_s19 }
   0x2   :  { %s18_s17 = scalar_lea.hbm %s189_s1, %s106_s14  ;;  %s112_s23 = scalar_lea.hbm %s189_s1, 256 }
   0x3   :  { %s110_s20 = scalar_lea.hbm %s18_s17, 256  ;;  %p113_p1 = scmp.lt.u32.totalorder %s18_s17, %s189_s1 }
   0x4   :  { %p111_p0 = scmp.ne.s32.totalorder %s18_s17, %s110_s20  ;;  %p114_p2 = scmp.lt.u32.totalorder %s112_s23, %s110_s20 }
   0x5   :  { %p116_p4 = scmp.lt.u32.totalorder %s110_s20, %s18_s17 }
   0x6   :  { %p115_p3 = por %p114_p2, %p113_p1 }
   0x8   :  { %p117_p5 = por %p116_p4, %p115_p3 }
   0xa   :  { %p118_p6 = pnand %p117_p5, %p111_p0 }
   0xc   :  { %121 = shalt.err (!%p118_p6)
}
   0xd   :  { %s122_s26 = scalar_lea.vmem %s21_s19, 256  ;;  %p127_p8 = scmp.lt.s32.totalorder %s21_s19, %s21_s19 }
   0xe   :  { %p123_p7 = scmp.ne.s32.totalorder %s21_s19, %s122_s26  ;;  %p128_p9 = scmp.lt.s32.totalorder %s122_s26, %s122_s26 }
  0x10   :  { %p129_p10 = por %p128_p9, %p127_p8 }
  0x12   :  { %p130_p11 = pnand %p129_p10, %p123_p7 }
  0x14   :  { %133 = shalt.err (!%p130_p11)
}
  0x15   :  { %23 = dma.hbm_to_vmem [thread:$0]  %s18_s17, 256, %s21_s19, [#allocation5]  }
  0x16   :  { %134 = dma.done.wait [#allocation5], 256  }
  0x17   :  { %135 = vsyncadd [#allocation5], 4294967040  ;;  %vm54_vm0 = vcmask 7168   ;;  %s105_s1 = sshll.u32 %s188_s0, 1  ;;  %v61_v0 = vlaneseq  ;;  %v137_v1 = vmov 0.0   ;;  %v138_v6 = vmov 0  }
  0x18   :  { %55 = vst.msk [vmem:[%s191_s3] sm:$0xff] %vm54_vm0, %v137_v1  ;;  %p45_p12 = scmp.lt.s32.totalorder %s105_s1, 1  ;;  %v56_v8 = vld [vmem:[#allocation4] sm:$0xff]  ;;  %v57_v9 = vld [vmem:[#allocation4 + $0x8] sm:$0xff] }
  0x19   :  { %v62_v2 = vshrl.u32 %v61_v0, 7 }
  0x1a   :  { %s193_s1 = smov (!%p45_p12, %s105_s1), 1 }
  0x1b   :  { %s47_s6 = scalar_lea.vmem %s190_s2, %s193_s1  ;;  %v63_v3 = vsub.s32 0, %v62_v2  ;;  %v67_v4 = vsub.s32 1, %v62_v2 }
  0x1c   :  { %v58_v5 = vld [vmem:[%s47_s6] sm:$0x3] }
  0x1d   :  { %vm59_vm1 = vcmp.ne.f32.partialorder %v58_v5, 0.0  ;;  %v78_v12 = vrot.slane %v58_v5, %v63_v3  ;;  %v82_v13 = vrot.slane %v58_v5, %v67_v4 }
  0x1e   :  { %v60_v7 = vsel %vm59_vm1, 1, %v138_v6 }
  0x1f   :  { %v64_v10 = vrot.slane %v60_v7, %v63_v3  ;;  %v68_v11 = vrot.slane %v60_v7, %v67_v4  ;;  %v73_v19 = vld [vmem:[%s191_s3] sm:$0xff] }
  0x21   :  { %vm69_vm2 = vcmp.eq.s32.totalorder %v64_v10, 1  ;;  %vm70_vm3 = vcmp.eq.s32.totalorder %v68_v11, 1 }
  0x22   :  { %v71_v14 = vsel %vm69_vm2, %v56_v8, 0.0  ;;  %v72_v15 = vsel %vm70_vm3, %v57_v9, 0.0 }
  0x23   :  { %v85_v16 = vmul.f32 %v78_v12, %v71_v14  ;;  %v86_v17 = vmul.f32 %v82_v13, %v72_v15 }
  0x25   :  { %v87_v18 = vadd.f32 %v86_v17, %v85_v16 }
  0x27   :  { %88 = vadd.xlane.f32.xlu0 %v87_v18 }
  0xb4   :  { %v89_v20 = vpop.xlane.xlu0 %88 }
  0xb5   :  { %v90_v21 = vadd.f32 %v89_v20, %v73_v19 }
  0xb7   :  { %92 = vst.msk [vmem:[%s191_s3] sm:$0xff] %vm54_vm0, %v90_v21 }
  0xb8   :  { %97 = vsyncpa [#allocation5], 1 }

</bundles_post_ra>
